<compile_context>
chip_gen: v5e
topology: v5e:2x2
jax: 0.10.0
libtpu: 0.0.40
codegen_flags: <defaults>
</compile_context>

<pallas_src>
import functools

import jax
import jax.numpy as jnp
from jax import lax
from jax.experimental import pallas as pl
from jax.experimental.pallas import tpu as pltpu

# The reference module uses a module-level constant `POW`; canonical PosNeg
# blocks use POW = 2.
POW = 2


def _pick_tile(dim, target, align):
    """Largest tile <= target that divides dim and respects TPU tile alignment.

    A full-extent block (tile == dim) is always legal, so small or awkward dims
    fall back to the whole axis.  NOTE: for very large awkward dims this
    fallback can exceed the VMEM budget; pad such dims at init if that matters.
    """
    if dim <= target:
        return dim
    t = (target // align) * align
    while t >= align:
        if dim % t == 0:
            return t
        t -= align
    return dim  # fallback: full extent


def _posneg_kernel(xp_ref, xn_ref, wa_ref, wb_ref, b_ref, y_ref):
    k = pl.program_id(3)

    @pl.when(k == 0)
    def _():
        y_ref[...] = jnp.zeros_like(y_ref)

    # (tm, tk) @ (tk, tn) -> (tm, tn), f32 accumulation on the MXU.
    part = lax.dot_general(
        xp_ref[...], wa_ref[0],
        (((1,), (0,)), ((), ())),
        preferred_element_type=jnp.float32)
    part -= lax.dot_general(
        xn_ref[...], wb_ref[0],
        (((1,), (0,)), ((), ())),
        preferred_element_type=jnp.float32)

    # Accumulate directly into the VMEM-resident f32 output block.
    y_ref[...] += part[None]

    @pl.when(k == pl.num_programs(3) - 1)
    def _():
        y_ref[...] = jnp.maximum(y_ref[...] + b_ref[...], 0.0).astype(y_ref.dtype)


def pack_params(params, compute_dtype=jnp.bfloat16):
    """One-time parameter packing (do at init time, NOT per forward call).

    Squares the weights in f32, transposes to (in_dim, out_dim), stacks the
    two heads on a leading axis, then casts to the matmul compute dtype.

      wa[h] : weights applied to x_pos for head h   (K, N)
      wb[h] : weights applied to x_neg for head h   (K, N)   (subtracted)
      b[h]  : bias for head h                       (1, N)   (kept f32)
    """
    sq_t = lambda w: (w.astype(jnp.float32) ** POW).T
    wa = jnp.stack([sq_t(params["weights_pos2pos"]),
                    sq_t(params["weights_pos2neg"])], axis=0)      # (2, K, N)
    wb = jnp.stack([sq_t(params["weights_neg2pos"]),
                    sq_t(params["weights_neg2neg"])], axis=0)      # (2, K, N)
    b = jnp.stack([params["bias_pos"],
                   params["bias_neg"]], axis=0)[:, None, :]        # (2, 1, N)
    return wa.astype(compute_dtype), wb.astype(compute_dtype), b.astype(jnp.float32)


@functools.partial(jax.jit, static_argnames=("tm", "tn", "tk"))
def posneg_linear(x_pos, x_neg, wa, wb, b, *, tm=512, tn=1024, tk=512):
    """Fused PosNegLinear forward. Returns (y_pos, y_neg), both f32 (M, N)."""
    M, K = x_pos.shape
    _, _, N = wa.shape
    compute_dtype = wa.dtype

    xp = x_pos.astype(compute_dtype)
    xn = x_neg.astype(compute_dtype)

    m_align = 16 if compute_dtype == jnp.bfloat16 else 8
    btm = _pick_tile(M, tm, m_align)
    btn = _pick_tile(N, tn, 128)
    btk = _pick_tile(K, tk, 128)
    grid = (2, M // btm, N // btn, K // btk)

    y = pl.pallas_call(
        _posneg_kernel,
        out_shape=jax.ShapeDtypeStruct((2, M, N), jnp.float32),
        grid_spec=pltpu.PrefetchScalarGridSpec(
            num_scalar_prefetch=0,
            grid=grid,
            in_specs=[
                pl.BlockSpec((btm, btk), lambda h, i, j, k: (i, k)),        # x_pos
                pl.BlockSpec((btm, btk), lambda h, i, j, k: (i, k)),        # x_neg
                pl.BlockSpec((1, btk, btn), lambda h, i, j, k: (h, k, j)),  # W from x_pos
                pl.BlockSpec((1, btk, btn), lambda h, i, j, k: (h, k, j)),  # W from x_neg
                pl.BlockSpec((1, 1, btn), lambda h, i, j, k: (h, 0, j)),    # bias
            ],
            out_specs=pl.BlockSpec((1, btm, btn), lambda h, i, j, k: (h, i, j)),
        ),
        compiler_params=pltpu.CompilerParams(
            dimension_semantics=("parallel", "parallel", "parallel", "arbitrary"),
            vmem_limit_bytes=48 << 20,  # safe on v7x (64 MiB), generous on v5e/v6e
        ),
    )(xp, xn, wa, wb, b)

    # Leading-axis head split: cheap slice, each head stays lane-dense.
    return y[0], y[1]


def init_params(key, in_dim, out_dim):
    ks = jax.random.split(key, 6)
    u = lambda k, shape: jax.random.uniform(k, shape, dtype=jnp.float32)  # torch.rand
    return {
        "weights_pos2pos": u(ks[0], (out_dim, in_dim)),
        "weights_pos2neg": u(ks[1], (out_dim, in_dim)),
        "weights_neg2pos": u(ks[2], (out_dim, in_dim)),
        "weights_neg2neg": u(ks[3], (out_dim, in_dim)),
        "bias_pos": u(ks[4], (out_dim,)),
        "bias_neg": u(ks[5], (out_dim,)),
    }


def reference(x_pos, x_neg, p):
    """Pure-JAX f32 reference matching the PyTorch module exactly."""
    lin = lambda x, w: x @ (w ** POW).T
    yp = jax.nn.relu(lin(x_pos, p["weights_pos2pos"])
                     - lin(x_neg, p["weights_neg2pos"]) + p["bias_pos"])
    yn = jax.nn.relu(lin(x_pos, p["weights_pos2neg"])
                     - lin(x_neg, p["weights_neg2neg"]) + p["bias_neg"])
    return yp, yn


if __name__ == "__main__":
    key = jax.random.PRNGKey(0)
    k_xp, k_xn, k_par = jax.random.split(key, 3)

    batch, in_dim, out_dim = 8, 32, 32
    x_pos = jax.random.uniform(k_xp, (batch, in_dim), dtype=jnp.float32)
    x_neg = jax.random.uniform(k_xn, (batch, in_dim), dtype=jnp.float32)
    params = init_params(k_par, in_dim, out_dim)

    yp_ref, yn_ref = reference(x_pos, x_neg, params)

    # --- f32 compute path: tight check against the module semantics ---------
    wa32, wb32, b32 = pack_params(params, compute_dtype=jnp.float32)
    yp32, yn32 = posneg_linear(x_pos, x_neg, wa32, wb32, b32)
    jax.block_until_ready((yp32, yn32))
    assert jnp.allclose(yp32, yp_ref, atol=1e-3, rtol=1e-3)
    assert jnp.allclose(yn32, yn_ref, atol=1e-3, rtol=1e-3)

    # --- bf16 compute path (default, fast): loose check ---------------------
    wa16, wb16, b16 = pack_params(params, compute_dtype=jnp.bfloat16)
    yp16, yn16 = posneg_linear(x_pos, x_neg, wa16, wb16, b16)
    jax.block_until_ready((yp16, yn16))
    assert jnp.allclose(yp16, yp_ref, atol=1e-1, rtol=2e-2)
    assert jnp.allclose(yn16, yn_ref, atol=1e-1, rtol=2e-2)

    print("KERNEL_OK")
</pallas_src>

<mosaic_0001>
module attributes {stable_mosaic.version = 11 : i64} {
  func.func @_posneg_kernel(%arg0: i32, %arg1: i32, %arg2: i32, %arg3: i32, %arg4: memref<8x32xf32, #tpu.memory_space<vmem>>, %arg5: memref<8x32xf32, #tpu.memory_space<vmem>>, %arg6: memref<1x32x32xf32, #tpu.memory_space<vmem>>, %arg7: memref<1x32x32xf32, #tpu.memory_space<vmem>>, %arg8: memref<1x1x32xf32, #tpu.memory_space<vmem>>, %arg9: memref<1x8x32xf32, #tpu.memory_space<vmem>>) attributes {dimension_semantics = [#tpu.dimension_semantics<parallel>, #tpu.dimension_semantics<parallel>, #tpu.dimension_semantics<parallel>, #tpu.dimension_semantics<arbitrary>], iteration_bounds = array<i64: 2, 1, 1, 1>, scalar_prefetch = 0 : i64, scratch_operands = 0 : i64, tpu.core_type = #tpu.core_type<tc>, window_params = [{transform_indices = @transform_0, window_bounds = array<i64: 8, 32>}, {transform_indices = @transform_1, window_bounds = array<i64: 8, 32>}, {transform_indices = @transform_2, window_bounds = array<i64: 1, 32, 32>}, {transform_indices = @transform_3, window_bounds = array<i64: 1, 32, 32>}, {transform_indices = @transform_4, window_bounds = array<i64: 1, 1, 32>}, {transform_indices = @transform_5, window_bounds = array<i64: 1, 8, 32>}]} {
    %c0_i32 = arith.constant 0 : i32
    %0 = arith.cmpi eq, %arg3, %c0_i32 : i32
    %1 = arith.extui %0 : i1 to i32
    %c0_i32_0 = arith.constant 0 : i32
    %2 = arith.cmpi ne, %1, %c0_i32_0 : i32
    scf.if %2 {
      %cst_19 = arith.constant 0.000000e+00 : f32
      %19 = vector.broadcast %cst_19 : f32 to vector<1x8x32xf32>
      %c0_20 = arith.constant 0 : index
      %c0_21 = arith.constant 0 : index
      %c0_22 = arith.constant 0 : index
      %20 = vector.load %arg9[%c0_20, %c0_21, %c0_22] : memref<1x8x32xf32, #tpu.memory_space<vmem>>, vector<1x8x32xf32>
      tpu.vector_store %arg9[%c0_20, %c0_21, %c0_22], %19 {strides = array<i32>} : memref<1x8x32xf32, #tpu.memory_space<vmem>>, vector<1x8x32xf32>,
    } else {
    }
    %c0 = arith.constant 0 : index
    %c0_1 = arith.constant 0 : index
    %3 = vector.load %arg4[%c0, %c0_1] : memref<8x32xf32, #tpu.memory_space<vmem>>, vector<8x32xf32>
    %c0_2 = arith.constant 0 : index
    %c0_3 = arith.constant 0 : index
    %c0_4 = arith.constant 0 : index
    %4 = vector.load %arg6[%c0_2, %c0_3, %c0_4] : memref<1x32x32xf32, #tpu.memory_space<vmem>>, vector<1x32x32xf32>
    %5 = vector.shape_cast %4 : vector<1x32x32xf32> to vector<32x32xf32>
    %cst = arith.constant dense<0.000000e+00> : vector<8x32xf32>
    %6 = tpu.matmul %3, %5, %cst {dimension_numbers = #tpu.dot_dimension_numbers<[1], [0], [0], [1], [0, 0, 1, 1], [], []>} : vector<8x32xf32>, vector<32x32xf32>, vector<8x32xf32> -> vector<8x32xf32>
    %c0_5 = arith.constant 0 : index
    %c0_6 = arith.constant 0 : index
    %7 = vector.load %arg5[%c0_5, %c0_6] : memref<8x32xf32, #tpu.memory_space<vmem>>, vector<8x32xf32>
    %c0_7 = arith.constant 0 : index
    %c0_8 = arith.constant 0 : index
    %c0_9 = arith.constant 0 : index
    %8 = vector.load %arg7[%c0_7, %c0_8, %c0_9] : memref<1x32x32xf32, #tpu.memory_space<vmem>>, vector<1x32x32xf32>
    %9 = vector.shape_cast %8 : vector<1x32x32xf32> to vector<32x32xf32>
    %cst_10 = arith.constant dense<0.000000e+00> : vector<8x32xf32>
    %10 = tpu.matmul %7, %9, %cst_10 {dimension_numbers = #tpu.dot_dimension_numbers<[1], [0], [0], [1], [0, 0, 1, 1], [], []>} : vector<8x32xf32>, vector<32x32xf32>, vector<8x32xf32> -> vector<8x32xf32>
    %11 = arith.subf %6, %10 : vector<8x32xf32>
    %c0_11 = arith.constant 0 : index
    %c0_12 = arith.constant 0 : index
    %c0_13 = arith.constant 0 : index
    %12 = vector.load %arg9[%c0_11, %c0_12, %c0_13] : memref<1x8x32xf32, #tpu.memory_space<vmem>>, vector<1x8x32xf32>
    %13 = vector.shape_cast %11 : vector<8x32xf32> to vector<1x8x32xf32>
    %14 = arith.addf %12, %13 : vector<1x8x32xf32>
    %c0_14 = arith.constant 0 : index
    %c0_15 = arith.constant 0 : index
    %c0_16 = arith.constant 0 : index
    %15 = vector.load %arg9[%c0_14, %c0_15, %c0_16] : memref<1x8x32xf32, #tpu.memory_space<vmem>>, vector<1x8x32xf32>
    tpu.vector_store %arg9[%c0_14, %c0_15, %c0_16], %14 {strides = array<i32>} : memref<1x8x32xf32, #tpu.memory_space<vmem>>, vector<1x8x32xf32>,
    %c0_i32_17 = arith.constant 0 : i32
    %16 = arith.cmpi eq, %arg3, %c0_i32_17 : i32
    %17 = arith.extui %16 : i1 to i32
    %c0_i32_18 = arith.constant 0 : i32
    %18 = arith.cmpi ne, %17, %c0_i32_18 : i32
    scf.if %18 {
      %c0_19 = arith.constant 0 : index
      %c0_20 = arith.constant 0 : index
      %c0_21 = arith.constant 0 : index
      %19 = vector.load %arg9[%c0_19, %c0_20, %c0_21] : memref<1x8x32xf32, #tpu.memory_space<vmem>>, vector<1x8x32xf32>
      %c0_22 = arith.constant 0 : index
      %c0_23 = arith.constant 0 : index
      %c0_24 = arith.constant 0 : index
      %20 = vector.load %arg8[%c0_22, %c0_23, %c0_24] : memref<1x1x32xf32, #tpu.memory_space<vmem>>, vector<1x1x32xf32>
      %21 = vector.broadcast %20 : vector<1x1x32xf32> to vector<1x8x32xf32>
      %22 = arith.addf %19, %21 : vector<1x8x32xf32>
      %cst_25 = arith.constant 0.000000e+00 : f32
      %23 = vector.broadcast %cst_25 : f32 to vector<1x8x32xf32>
      %24 = arith.maximumf %22, %23 : vector<1x8x32xf32>
      %c0_26 = arith.constant 0 : index
      %c0_27 = arith.constant 0 : index
      %c0_28 = arith.constant 0 : index
      %25 = vector.load %arg9[%c0_26, %c0_27, %c0_28] : memref<1x8x32xf32, #tpu.memory_space<vmem>>, vector<1x8x32xf32>
      tpu.vector_store %arg9[%c0_26, %c0_27, %c0_28], %24 {strides = array<i32>} : memref<1x8x32xf32, #tpu.memory_space<vmem>>, vector<1x8x32xf32>,
    } else {
    }
    return
  }
  func.func @transform_0(%arg0: i32, %arg1: i32, %arg2: i32, %arg3: i32) -> (i32, i32) {
    %c0_i32 = arith.constant 0 : i32
    return %arg1, %arg3 : i32, i32
  }
  func.func @transform_1(%arg0: i32, %arg1: i32, %arg2: i32, %arg3: i32) -> (i32, i32) {
    %c0_i32 = arith.constant 0 : i32
    return %arg1, %arg3 : i32, i32
  }
  func.func @transform_2(%arg0: i32, %arg1: i32, %arg2: i32, %arg3: i32) -> (i32, i32, i32) {
    %c0_i32 = arith.constant 0 : i32
    return %arg0, %arg3, %arg2 : i32, i32, i32
  }
  func.func @transform_3(%arg0: i32, %arg1: i32, %arg2: i32, %arg3: i32) -> (i32, i32, i32) {
    %c0_i32 = arith.constant 0 : i32
    return %arg0, %arg3, %arg2 : i32, i32, i32
  }
  func.func @transform_4(%arg0: i32, %arg1: i32, %arg2: i32, %arg3: i32) -> (i32, i32, i32) {
    %c0_i32 = arith.constant 0 : i32
    %c0_i32_0 = arith.constant 0 : i32
    return %arg0, %c0_i32, %arg2 : i32, i32, i32
  }
  func.func @transform_5(%arg0: i32, %arg1: i32, %arg2: i32, %arg3: i32) -> (i32, i32, i32) {
    %c0_i32 = arith.constant 0 : i32
    return %arg0, %arg1, %arg2 : i32, i32, i32
  }
}

</mosaic_0001>

<bundles_post_ra>
// kernel: posneg_linear.1
= control target key start
LH: loop header
LB: loop body
LE: loop exit
PB: predicated region body
PF: predicated region fallthrough
CT: control target
= control target key end

     0   :  { %s1132_s0 = inlined_call_operand.hbm [shape: f32[8,32], index: 0, kind: input, shape index: {}]   ;;  %s1133_s1 = inlined_call_operand.hbm [shape: f32[8,32], index: 1, kind: input, shape index: {}]   ;;  %s1134_s2 = inlined_call_operand.hbm [shape: f32[2,32,32], index: 2, kind: input, shape index: {}]   ;;  %s1135_s3 = inlined_call_operand.hbm [shape: f32[2,32,32], index: 3, kind: input, shape index: {}]   ;;  %s1136_s4 = inlined_call_operand.vmem [shape: f32[2,1,32], index: 4, kind: input, shape index: {}]   ;;  %s1137_s5 = inlined_call_operand.vmem [shape: f32[2,8,32], index: 5, kind: output, shape index: {}]  }
   0x1   :  { %1141 = sst [smem:[#allocation14_spill]] %s1132_s0 }
   0x2   :  { %1142 = sst [smem:[#allocation15_spill]] %s1134_s2 }
   0x3   :  { %10 = vsyncpa [#allocation3], 0 }
   0x4   :  { %11 = vsyncpa [#allocation5], 0  ;;  %s980_s18 = smov 0   ;;  %s982_s19 = smov 0  }
   0x5   :  { %s984_s20 = smov 0   ;;  %s986_s21 = smov 0  }
   0x6   :  { %s988_s22 = smov 0   ;;  %s990_s23 = smov 0  }
   0x7 LB: > { %1143 = sst [smem:[#allocation11_spill]] %s939_s22  ;;  %s1138_s24 = sadd.s32 4294967295, %s943_s23   ;;  %s943_s23 = sphi %s990_s23, %s17_s23   ;;  %s939_s22 = sphi %s988_s22, %s1157_s22   ;;  %s935_s21 = sphi %s986_s21, %s1161_s21   ;;  %s931_s20 = sphi %s984_s20, %s1160_s20   ;;  %s927_s19 = sphi %s982_s19, %s1159_s19   ;;  %s923_s18 = sphi %s980_s18, %s1158_s18  }
   0x8   : > { %s110_s25 = sadd.s32 1, %s931_s20  ;;  %p117_p0 = scmp.ne.s32.totalorder %s931_s20, %s927_s19 }
   0x9   : > { %p118_p1 = scmp.eq.s32.totalorder %s943_s23, 0  ;;  %p123_p2 = scmp.ne.s32.totalorder %s927_s19, %s923_s18 }
   0xa   : > { %p1016_p3 = scmp.eq.s32.totalorder %s1138_s24, 0  ;;  %p658_p5 = scmp.ge.s32.totalorder %s943_s23, 1 }
   0xb   : > { %p1020_p4 = por %p118_p1, %p117_p0  ;;  %p222_p7 = scmp.lt.s32.totalorder %s943_s23, 3 }
   0xc   : > { %p1027_p6 = por %p1016_p3, %p123_p2  ;;  %s1147_s0 = sld [smem:[#allocation14_spill]] }
   0xd   : > { %p1035_p8 = pnand %p658_p5, %p222_p7  ;;  %s945_s8 = smov [#allocation2]  }
   0xe   : > { %s239_s9 = sshll.u32 %s945_s8, 4  ;;  %p708_p10 = scmp.lt.s32.totalorder %s943_s23, 2  ;;  %s240_s9 = int_to_ptr.vmem [resolvable:$true] %s239_s9 }
   0xf   : > { %p692_p9 = pneg %p1035_p8  ;;  %s43_s12 = sadd.s32 1, %s939_s22 }
  0x10   : > { %p1050_p12 = pnand %p708_p10, %p1020_p4  ;;  %p45_p13 = scmp.ge.s32.totalorder %s43_s12, 2 }
  0x11   : > { %p1044_p11 = pnand %p692_p9, %p1016_p3  ;;  %s265_s13 = sand.u32 1, %s943_s23  }
  0x12   : > { %s237_s6 = sshll.u32 %s1147_s0, 4  ;;  %s267_s14 = sand.u32 1, %s931_s20   ;;  %s238_s6 = int_to_ptr.hbm [resolvable:$true] %s237_s6 }
  0x13   : > { %695 = dma.hbm_to_vmem [thread:$0]  (!%p1044_p11), %s238_s6, 128, %s240_s9, [#allocation3]  }
  0x14   : > { %s1163_s12 = smov (%p45_p13, %s43_s12), 0  ;;  %s662_s15 = sshll.u32 %s267_s14, 5 }
  0x15   : > { %1151 = sst [smem:[#allocation12_spill]] %s1163_s12  ;;  %s103_s16 = ssub.s32 %s939_s22, %s1163_s12 }
  0x16   : > { %p108_p0 = scmp.eq.s32.totalorder %s103_s16, 0  ;;  %s678_s17 = sshll.u32 %s939_s22, 5 }
  0x17   : > { %s1152_s2 = sld [smem:[#allocation15_spill]]  ;;  %s269_s30 = scalar_lea.vmem [#allocation6], %s662_s15 }
  0x18   : > { %s280_s8 = sshll.u32 %s269_s30, 4  ;;  %s252_s14 = sshll.u32 %s1133_s1, 4  ;;  %s281_s8 = int_to_ptr.vmem [resolvable:$true] %s280_s8  ;;  %s253_s14 = int_to_ptr.hbm [resolvable:$true] %s252_s14 }
  0x19   : > { %s1070_s6 = scalar_select %p108_p0, %s931_s20, %s110_s25  }
  0x1a   : > { %s266_s16 = scalar_lea.sflag [#allocation3], %s265_s13  ;;  %s946_s12 = smov 128  }
  0x1b   : > { %1153 = sst [smem:[#allocation13_spill]] %s1070_s6  ;;  %s947_s22 = smov 8  }
  0x1c   : > { %s948_s18 = smov [#allocation4]   ;;  %s294_s6 = scalar_lea.vmem [#allocation7], %s662_s15 }
  0x1d   : > { %s277_s29 = scalar_lea.hbm %s1152_s2, %s678_s17  ;;  %s254_s27 = sshll.u32 %s948_s18, 4  ;;  %s255_s27 = int_to_ptr.vmem [resolvable:$true] %s254_s27 }
  0x1e   : > { %s278_s9 = sshll.u32 %s277_s29, 4  ;;  %s302_s29 = scalar_lea.hbm %s1135_s3, %s678_s17  ;;  %s279_s9 = int_to_ptr.hbm [resolvable:$true] %s278_s9 }
  0x1f   : > { %702 = dma.hbm_to_vmem [thread:$0]  (!%p1050_p12), %s279_s9, 512, %s281_s8, %s266_s16, %s946_s12, %s946_s12, %s947_s22  }
  0x20   : > { %698 = dma.hbm_to_vmem [thread:$0]  (!%p1044_p11), %s253_s14, 128, %s255_s27, [#allocation5]  }
  0x21   : > { %s303_s2 = sshll.u32 %s302_s29, 4  ;;  %s305_s0 = sshll.u32 %s294_s6, 4  ;;  %s304_s2 = int_to_ptr.hbm [resolvable:$true] %s303_s2  ;;  %s306_s0 = int_to_ptr.vmem [resolvable:$true] %s305_s0 }
  0x22   : > { %705 = dma.hbm_to_vmem [thread:$0]  (!%p1050_p12), %s304_s2, 512, %s306_s0, %s266_s16, %s946_s12, %s946_s12, %s947_s22  }
  0x23   : > { %326 = sbr.rel (%p1035_p8) target bundleno = 199 (0xc7), region = 40 }
  0x28   : > { %910 = dma.done.wait (%p1016_p3), [#allocation3], 128  }
  0x29   : > { %912 = vsyncadd (%p1016_p3), [#allocation3], 4294967168 }
  0x2a   : > { %914 = dma.done.wait (%p1016_p3), [#allocation5], 128  }
  0x2b   : > { %916 = vsyncadd (%p1016_p3), [#allocation5], 4294967168  ;;  %s1154_s24 = sadd.s32 4294967295, %s943_s23   ;;  %s340_s22 = sand.u32 1, %s927_s19  }
  0x2c   : > { %s338_s2 = sand.u32 1, %s1154_s24   ;;  %s671_s7 = sshll.u32 %s340_s22, 5 }
  0x2d   : > { %s339_s10 = scalar_lea.sflag [#allocation3], %s338_s2  ;;  %s342_s11 = scalar_lea.vmem [#allocation6], %s671_s7 }
  0x2e   : > { %918 = dma.done.wait (%p1027_p6), %s339_s10, 1024  }
  0x2f   : > { %920 = vsyncadd (%p1027_p6), %s339_s10, 4294966272  ;;  %p398_p1 = scmp.lt.s32.totalorder %s935_s21, 1  ;;  %v424_v0 = vld [vmem:[%s342_s11 + $0x18] sm:$0xff]  ;;  %s352_s26 = scalar_lea.vmem [#allocation7], %s671_s7  ;;  %v423_v2 = vld [vmem:[%s342_s11 + $0x10] sm:$0xff]  ;;  %vm418_vm0 = vcmask 261120  }
  0x30   : > { %v453_v1 = vld [vmem:[%s352_s26 + $0x18] sm:$0xff]  ;;  %441 = vmatpush.msra.mxu0 %v424_v0  ;;  %v452_v3 = vld [vmem:[%s352_s26 + $0x10] sm:$0xff]  ;;  %v422_v4 = vld [vmem:[%s342_s11 + $0x8] sm:$0xff]  ;;  %v949_v10 = vmov 0.0  }
  0x31   : > { %469 = vmatpush.msra.mxu1 %v453_v1  ;;  %v451_v5 = vld [vmem:[%s352_s26 + $0x8] sm:$0xff]  ;;  %s1165_s21 = smov (!%p398_p1, %s935_s21), 1  ;;  %v421_v6 = vld [vmem:[%s342_s11] sm:$0xff]  ;;  %v420_v8 = vld [vmem:[#allocation2] sm:$0xff] }
  0x32   : > { %442 = vmatpush.msra.mxu0 %v423_v2  ;;  %v450_v7 = vld [vmem:[%s352_s26] sm:$0xff]  ;;  %v449_v9 = vld [vmem:[#allocation4] sm:$0xff]  ;;  %s403_s13 = scalar_lea.vmem %s1136_s4, %s1165_s21  ;;  %s673_s15 = sshll.u32 %s1165_s21, 3 }
  0x33   : > { %470 = vmatpush.msra.mxu1 %v452_v3  ;;  %s413_s6 = scalar_lea.vmem %s1137_s5, %s673_s15  ;;  %v764_v16 = vld [vmem:[%s403_s13] ss:$0 sm:$0xff] }
  0x34   : > { %443 = vmatpush.msra.mxu0 %v422_v4  ;;  %419 = vst.msk [vmem:[%s413_s6] sm:$0xff] %vm418_vm0, %v949_v10 }
  0x35   : > { %471 = vmatpush.msra.mxu1 %v451_v5 }
  0x36   : > { %444 = vmatpush.msra.mxu0 %v421_v6 }
  0x37   : > { %472 = vmatpush.msra.mxu1 %v450_v7  ;;  %674 = vmatmul.msk.f32.vlgmr.msra.gmra.mxu0 %vm418_vm0, %v420_v8 }
  0x38   : > { %675 = vmatmul.msk.f32.vlgmr.msra.gmra.mxu1 %vm418_vm0, %v449_v9 }
  0x3b   : > { %v478_v13 = vld [vmem:[%s413_s6] sm:$0xff] }
  0xb4   : > { %v446_v11 = vpop.f32.mrf.mxu0 }
  0xb5   : > { %v474_v12 = vpop.f32.mrf.mxu1 }
  0xb6   : > { %v477_v14 = vsub.f32 %v446_v11, %v474_v12 }
  0xb8   : > { %v479_v15 = vadd.f32 %v478_v13, %v477_v14 }
  0xba   : > { %480 = vst.msk [vmem:[%s413_s6] sm:$0xff] %vm418_vm0, %v479_v15 }
  0xc1   : > { %v484_v17 = vld [vmem:[%s413_s6] sm:$0xff] }
  0xc2   : > { %v489_v18 = vadd.f32 %v764_v16, %v484_v17 }
  0xc4   : > { %v490_v19 = vmax.f32 %v489_v18, 0.0 }
  0xc6   : > { %491 = vst.msk [vmem:[%s413_s6] sm:$0xff] %vm418_vm0, %v490_v19 }
  0xc7 PF: > { %s17_s23 = sadd.s32 1, %s943_s23   ;;  %s1155_s21 = sld [smem:[#allocation13_spill]] }
  0xc8   : > { %p14_p2 = scmp.ge.s32.totalorder %s17_s23, 4   ;;  %s1156_s9 = sld [smem:[#allocation11_spill]] }
  0xc9   : > { %s1157_s22 = sld [smem:[#allocation12_spill]]  ;;  %s1158_s18 = smov %s927_s19 }
  0xca   : > { %s1159_s19 = smov %s931_s20  ;;  %16 = sbr.rel (!%p14_p2) target bundleno = 7 (0x7), region = 111 }
  0xcd   : > { %s1160_s20 = smov %s1155_s21 }
  0xce   : > { %s1161_s21 = smov %s1156_s9 }
  0xcf   :  { %523 = vsyncpa [#allocation3], 1 }
  0xd0   :  { %525 = vsyncpa [#allocation3 + $0x1], 1 }
  0xd1   :  { %526 = vsyncpa [#allocation5], 1 }

</bundles_post_ra>
